<compile_context>
chip_gen: v7x
topology: tpu7x:2x2x1
jax: 0.10.0
libtpu: 0.0.40
codegen_flags: <defaults>
</compile_context>

<pallas_src>
import numpy as np
import jax
import jax.numpy as jnp
from jax import lax
from jax.experimental import pallas as pl
from jax.experimental.pallas import tpu as pltpu


def _round_up(x: int, m: int) -> int:
    return ((x + m - 1) // m) * m


def _cdiv(a: int, b: int) -> int:
    return (a + b - 1) // b


def _vmem_capacity_bytes() -> int:
    """Per-core VMEM capacity; conservative default if the query is unavailable."""
    try:
        return int(pltpu.get_tpu_info().vmem_capacity_bytes)
    except Exception:
        return 64 << 20  # v7x per-core VMEM; v5e/v6e have 128 MiB


def _permute_kernel(x_ref, pm_ref, o_ref):
    # x_ref:  (TB, F)  input row tile (full feature extent, no padding)
    # pm_ref: (F, TN)  one-hot permutation columns (resident or N-tiled)
    # o_ref:  (TB, TN) output tile:  o[b, j] = x[b, p[j]]
    # One 1.0 per pm column + f32 accumulation + HIGHEST precision keeps the
    # permutation bit-exact for f32 inputs (no bf16 truncation of x).
    o_ref[...] = jnp.dot(
        x_ref[...],
        pm_ref[...],
        preferred_element_type=jnp.float32,
        precision=lax.Precision.HIGHEST,
    ).astype(o_ref.dtype)


class Permutation:
    """JAX/Pallas equivalent of the PyTorch Permutation module."""

    def __init__(self, in_features: int, p=None):
        self.in_features = in_features
        if p is None:
            # Deterministic "random" permutation (seeded) instead of np.random.
            rng = np.random.default_rng(0)
            self.p = rng.permutation(in_features)
        elif isinstance(p, str) and p == "flip":
            self.p = np.array(list(reversed(range(in_features))), dtype=np.int64)
        else:
            self.p = np.asarray(p, dtype=np.int64)

        # One-hot permutation matrix: out = x @ pm with pm[i, j] = (i == p[j]).
        # Stored unpadded (F, F); cast once per input dtype (0/1 is exact in
        # bf16/f16/f32), so no per-grid-step cast inside the kernel.
        pm = np.zeros((in_features, in_features), dtype=np.float32)
        pm[self.p, np.arange(in_features)] = 1.0
        self._pm_np = pm
        self._pm_cache = {}

    # ------------------------------------------------------------------ utils

    def _pm_for(self, dtype):
        key = jnp.dtype(dtype)
        if key not in self._pm_cache:
            self._pm_cache[key] = jnp.asarray(self._pm_np, dtype=key)
        return self._pm_cache[key]

    def _plan(self, B: int, F: int, itemsize: int):
        """Pick (TB, TN, vmem_limit) from the per-generation VMEM budget."""
        cap = _vmem_capacity_bytes()
        budget = (cap * 3) // 4  # ~96 MiB on v5e/v6e (128 MiB), ~48 MiB on v7x (64 MiB)

        f_lane = _round_up(F, 128)                       # lane padding in VMEM
        sublane = 8 * max(1, 4 // max(1, itemsize))      # 8 (f32) / 16 (bf16) / 32 (i8)
        f_sub = _round_up(F, sublane)                    # sublane padding of pm rows

        pm_full = f_sub * f_lane * itemsize
        if 2 * pm_full <= budget // 2:
            # Whole one-hot matrix stays resident in VMEM across the grid.
            # Budget conservatively for 2 copies so the double-buffered
            # compatibility fallback also fits; the primary path single-buffers.
            tn = F
            pm_vmem = 2 * pm_full
        else:
            # Guard: do NOT collapse TB — tile pm along the output-feature axis.
            tn_max = (budget // 2) // max(1, 2 * f_sub * itemsize)
            tn = min(f_lane, max(128, (tn_max // 128) * 128))
            pm_vmem = 2 * f_sub * tn * itemsize

        # x + out row tiles, double-buffered by the auto-pipeline.
        row_bytes = 2 * 2 * f_lane * itemsize
        tb_max = max(8, (budget - pm_vmem) // row_bytes)
        tb = min(int(tb_max), 4096, _round_up(B, 8))
        tb = max(8, (tb // 8) * 8)

        # Keep >= 4 batch-grid steps (v7x has 2 TCs; also helps pipeline overlap)
        # as long as tiles can stay >= 256 rows.
        tb_steps = _round_up(max(_cdiv(B, 4), 8), 8)
        if tb_steps >= 256:
            tb = min(tb, tb_steps)

        vmem_need = row_bytes * tb + pm_vmem + (4 << 20)
        vmem_limit = int(min(cap, max(vmem_need, 16 << 20)))
        return tb, tn, vmem_limit

    def _run(self, x, pm, tb, tn, nb, nn, vmem_limit, *, single_buffer_pm):
        B, F = x.shape
        itemsize = jnp.dtype(x.dtype).itemsize

        pm_kwargs = {}
        if single_buffer_pm:
            # Constant-index resident operand: one VMEM copy is enough.
            pm_kwargs["pipeline_mode"] = pl.Buffered(1)
        pm_spec = pl.BlockSpec((F, tn), lambda j, i: (0, j), **pm_kwargs)

        return pl.pallas_call(
            _permute_kernel,
            out_shape=jax.ShapeDtypeStruct((B, F), x.dtype),
            grid=(nn, nb),  # batch innermost: x streams, pm stays put per j
            in_specs=[
                pl.BlockSpec((tb, F), lambda j, i: (i, 0)),  # x: no feature padding
                pm_spec,                                     # pm: resident / N-tiled
            ],
            out_specs=pl.BlockSpec((tb, tn), lambda j, i: (i, j)),
            compiler_params=pltpu.CompilerParams(
                dimension_semantics=("parallel", "parallel"),
                vmem_limit_bytes=vmem_limit,
            ),
            cost_estimate=pl.CostEstimate(
                flops=2 * B * F * F,
                bytes_accessed=2 * B * F * itemsize + F * F * itemsize,
                transcendentals=0,
            ),
        )(x, pm)

    # --------------------------------------------------------------- forward

    def __call__(self, inputs: jnp.ndarray):
        B, F = inputs.shape
        assert F == self.in_features
        # NOTE: the matmul formulation only supports floating dtypes; torch's
        # x[:, p] works for any dtype.
        # TODO(synk): add a gather-based path for integer inputs.
        assert jnp.issubdtype(inputs.dtype, jnp.floating), (
            "Permutation Pallas kernel expects a floating-point input dtype."
        )

        itemsize = jnp.dtype(inputs.dtype).itemsize
        pm = self._pm_for(inputs.dtype)
        tb, tn, vmem_limit = self._plan(B, F, itemsize)
        nn = _cdiv(F, tn)
        nb = _cdiv(B, tb)

        single_buffer_pm = nn == 1
        try:
            out = self._run(inputs, pm, tb, tn, nb, nn, vmem_limit,
                            single_buffer_pm=single_buffer_pm)
        except Exception:
            if not single_buffer_pm:
                raise
            # Compatibility fallback: if this jax build rejects
            # pipeline_mode=pl.Buffered(1), rerun with default double-buffering
            # (still correct; pm is simply kept in two VMEM copies).
            out = self._run(inputs, pm, tb, tn, nb, nn, vmem_limit,
                            single_buffer_pm=False)

        logdet = jnp.zeros((), dtype=inputs.dtype)  # permutation has |det J| = 1
        return out, logdet

    def __repr__(self):
        return "Permutation(in_features={}, p={})".format(
            self.in_features, list(self.p)
        )


if __name__ == "__main__":
    batch, in_features = 8, 32

    key = jax.random.PRNGKey(0)
    x = jax.random.normal(key, (batch, in_features), dtype=jnp.float32)

    # Deterministic seeded permutation.
    module = Permutation(in_features)
    out, logdet = module(x)
    out = jax.block_until_ready(out)

    # Reference check against plain numpy fancy-indexing semantics (exact).
    ref = np.asarray(x)[:, module.p]
    np.testing.assert_allclose(np.asarray(out), ref, rtol=0, atol=0)
    assert float(logdet) == 0.0

    # Also check the 'flip' permutation variant.
    module_flip = Permutation(in_features, p="flip")
    out_f, logdet_f = module_flip(x)
    out_f = jax.block_until_ready(out_f)
    np.testing.assert_allclose(np.asarray(out_f), np.asarray(x)[:, ::-1],
                               rtol=0, atol=0)
    assert float(logdet_f) == 0.0

    print("KERNEL_OK")
</pallas_src>

<mosaic_0001>
module attributes {stable_mosaic.version = 11 : i64} {
  func.func @_permute_kernel(%arg0: i32, %arg1: i32, %arg2: memref<8x32xf32, #tpu.memory_space<vmem>>, %arg3: memref<32x32xf32, #tpu.memory_space<vmem>>, %arg4: memref<8x32xf32, #tpu.memory_space<vmem>>) attributes {dimension_semantics = [#tpu.dimension_semantics<parallel>, #tpu.dimension_semantics<parallel>], iteration_bounds = array<i64: 1, 1>, scalar_prefetch = 0 : i64, scratch_operands = 0 : i64, tpu.core_type = #tpu.core_type<tc>, window_params = [{transform_indices = @transform_0, window_bounds = array<i64: 8, 32>}, {pipeline_mode = #tpu.pipeline_mode<synchronous>, transform_indices = @transform_1, window_bounds = array<i64: 32, 32>}, {transform_indices = @transform_2, window_bounds = array<i64: 8, 32>}]} {
    %c0 = arith.constant 0 : index
    %c0_0 = arith.constant 0 : index
    %0 = vector.load %arg2[%c0, %c0_0] : memref<8x32xf32, #tpu.memory_space<vmem>>, vector<8x32xf32>
    %c0_1 = arith.constant 0 : index
    %c0_2 = arith.constant 0 : index
    %1 = vector.load %arg3[%c0_1, %c0_2] : memref<32x32xf32, #tpu.memory_space<vmem>>, vector<32x32xf32>
    %cst = arith.constant dense<0.000000e+00> : vector<8x32xf32>
    %2 = tpu.matmul %0, %1, %cst {dimension_numbers = #tpu.dot_dimension_numbers<[1], [0], [0], [1], [0, 0, 1, 1], [], []>, precision = #tpu.contract_precision<fp32>} : vector<8x32xf32>, vector<32x32xf32>, vector<8x32xf32> -> vector<8x32xf32>
    %c0_3 = arith.constant 0 : index
    %c0_4 = arith.constant 0 : index
    %3 = vector.load %arg4[%c0_3, %c0_4] : memref<8x32xf32, #tpu.memory_space<vmem>>, vector<8x32xf32>
    tpu.vector_store %arg4[%c0_3, %c0_4], %2 {strides = array<i32>} : memref<8x32xf32, #tpu.memory_space<vmem>>, vector<8x32xf32>,
    return
  }
  func.func @transform_0(%arg0: i32, %arg1: i32) -> (i32, i32) {
    %c0_i32 = arith.constant 0 : i32
    %c0_i32_0 = arith.constant 0 : i32
    return %arg1, %c0_i32 : i32, i32
  }
  func.func @transform_1(%arg0: i32, %arg1: i32) -> (i32, i32) {
    %c0_i32 = arith.constant 0 : i32
    %c0_i32_0 = arith.constant 0 : i32
    return %c0_i32, %arg0 : i32, i32
  }
  func.func @transform_2(%arg0: i32, %arg1: i32) -> (i32, i32) {
    %c0_i32 = arith.constant 0 : i32
    return %arg1, %arg0 : i32, i32
  }
}

module attributes {stable_mosaic.version = 11 : i64} {
  func.func @_permute_kernel(%arg0: i32, %arg1: i32, %arg2: memref<8x32xf32, #tpu.memory_space<vmem>>, %arg3: memref<32x32xf32, #tpu.memory_space<vmem>>, %arg4: memref<8x32xf32, #tpu.memory_space<vmem>>) attributes {dimension_semantics = [#tpu.dimension_semantics<parallel>, #tpu.dimension_semantics<parallel>], iteration_bounds = array<i64: 1, 1>, scalar_prefetch = 0 : i64, scratch_operands = 0 : i64, tpu.core_type = #tpu.core_type<tc>, window_params = [{transform_indices = @transform_0, window_bounds = array<i64: 8, 32>}, {transform_indices = @transform_1, window_bounds = array<i64: 32, 32>}, {transform_indices = @transform_2, window_bounds = array<i64: 8, 32>}]} {
    %c0 = arith.constant 0 : index
    %c0_0 = arith.constant 0 : index
    %0 = vector.load %arg2[%c0, %c0_0] : memref<8x32xf32, #tpu.memory_space<vmem>>, vector<8x32xf32>
    %c0_1 = arith.constant 0 : index
    %c0_2 = arith.constant 0 : index
    %1 = vector.load %arg3[%c0_1, %c0_2] : memref<32x32xf32, #tpu.memory_space<vmem>>, vector<32x32xf32>
    %cst = arith.constant dense<0.000000e+00> : vector<8x32xf32>
    %2 = tpu.matmul %0, %1, %cst {dimension_numbers = #tpu.dot_dimension_numbers<[1], [0], [0], [1], [0, 0, 1, 1], [], []>, precision = #tpu.contract_precision<fp32>} : vector<8x32xf32>, vector<32x32xf32>, vector<8x32xf32> -> vector<8x32xf32>
    %c0_3 = arith.constant 0 : index
    %c0_4 = arith.constant 0 : index
    %3 = vector.load %arg4[%c0_3, %c0_4] : memref<8x32xf32, #tpu.memory_space<vmem>>, vector<8x32xf32>
    tpu.vector_store %arg4[%c0_3, %c0_4], %2 {strides = array<i32>} : memref<8x32xf32, #tpu.memory_space<vmem>>, vector<8x32xf32>,
    return
  }
  func.func @transform_0(%arg0: i32, %arg1: i32) -> (i32, i32) {
    %c0_i32 = arith.constant 0 : i32
    %c0_i32_0 = arith.constant 0 : i32
    return %arg1, %c0_i32 : i32, i32
  }
  func.func @transform_1(%arg0: i32, %arg1: i32) -> (i32, i32) {
    %c0_i32 = arith.constant 0 : i32
    %c0_i32_0 = arith.constant 0 : i32
    return %c0_i32, %arg0 : i32, i32
  }
  func.func @transform_2(%arg0: i32, %arg1: i32) -> (i32, i32) {
    %c0_i32 = arith.constant 0 : i32
    return %arg1, %arg0 : i32, i32
  }
}

</mosaic_0001>

<bundles_post_ra>
// kernel: tpu_custom_call.1
= control target key start
LH: loop header
LB: loop body
LE: loop exit
PB: predicated region body
PF: predicated region fallthrough
CT: control target
= control target key end

     0   :  { %7 = vsyncpa [#allocation3], 0  ;;  %s862_s0 = inlined_call_operand.hbm [shape: f32[8,32], index: 0, kind: input, shape index: {}]   ;;  %s863_s1 = inlined_call_operand.hbm [shape: f32[32,32], index: 1, kind: input, shape index: {}]   ;;  %s864_s2 = inlined_call_operand.hbm [shape: f32[8,32], index: 2, kind: output, shape index: {}]  }
   0x1   :  { %8 = vsyncpa [#allocation6], 0 }
   0x2   :  { %9 = vsyncpa [#allocation4], 0  ;;  %s770_s9 = smov [#allocation2]   ;;  %s771_s11 = smov [#allocation5]  }
   0x3   :  { %s16_s10 = sshll.u32 %s770_s9, 4  ;;  %s25_s12 = sshll.u32 %s771_s11, 4  ;;  %s17_s10 = int_to_ptr.vmem [resolvable:$true] %s16_s10  ;;  %s793_s12 = int_to_ptr.vmem [resolvable:$true] %s25_s12 }
   0x4   :  { %s698_s15 = scalar_lea.hbm %s862_s0, 128 }
   0x5   :  { %p699_p0 = scmp.ne.s32.totalorder %s862_s0, %s698_s15  ;;  %p702_p1 = scmp.lt.u32.totalorder %s698_s15, %s862_s0 }
   0x7   :  { %p704_p2 = pnand %p702_p1, %p699_p0 }
   0x9   :  { %707 = shalt.err (!%p704_p2)
}
   0xa   :  { %s708_s20 = scalar_lea.vmem %s17_s10, 128  ;;  %p713_p4 = scmp.lt.s32.totalorder %s17_s10, %s17_s10 }
   0xb   :  { %p709_p3 = scmp.ne.s32.totalorder %s17_s10, %s708_s20  ;;  %p714_p5 = scmp.lt.s32.totalorder %s708_s20, %s708_s20 }
   0xd   :  { %p715_p6 = por %p714_p5, %p713_p4 }
   0xf   :  { %p716_p7 = pnand %p715_p6, %p709_p3 }
  0x11   :  { %719 = shalt.err (!%p716_p7)
}
  0x12   :  { %19 = dma.hbm_to_vmem [thread:$0]  %s862_s0, 128, %s17_s10, [#allocation3]  }
  0x13   :  { %s720_s25 = scalar_lea.hbm %s863_s1, 512 }
  0x14   :  { %p721_p8 = scmp.ne.s32.totalorder %s863_s1, %s720_s25  ;;  %p724_p9 = scmp.lt.u32.totalorder %s720_s25, %s863_s1 }
  0x16   :  { %p726_p10 = pnand %p724_p9, %p721_p8 }
  0x18   :  { %729 = shalt.err (!%p726_p10)
}
  0x19   :  { %s730_s30 = scalar_lea.vmem %s793_s12, 512  ;;  %p735_p12 = scmp.lt.s32.totalorder %s793_s12, %s793_s12 }
  0x1a   :  { %p731_p11 = scmp.ne.s32.totalorder %s793_s12, %s730_s30  ;;  %p736_p13 = scmp.lt.s32.totalorder %s730_s30, %s730_s30 }
  0x1c   :  { %p737_p0 = por %p736_p13, %p735_p12 }
  0x1e   :  { %p738_p1 = pnand %p737_p0, %p731_p11 }
  0x20   :  { %741 = shalt.err (!%p738_p1)
}
  0x21   :  { %s772_s0 = smov 128   ;;  %s773_s3 = smov 8  }
  0x22   :  { %31 = dma.hbm_to_vmem [thread:$0]  %s863_s1, 512, %s793_s12, [#allocation6], %s772_s0, %s772_s0, %s773_s3  }
  0x23   :  { %764 = dma.done.wait [#allocation3], 128  }
  0x24   :  { %765 = vsyncadd [#allocation3], 4294967168 }
  0x25   :  { %766 = dma.done.wait [#allocation6], 512  }
  0x26   :  { %767 = vsyncadd [#allocation6], 4294966784  ;;  %v774_v0 = vmov 0.0|0.0   ;;  %vm775_vm0 = vmmov 0   ;;  %v776_v1 = vmov 0.0   ;;  %vm43_vm1 = vcmask 261120  }
  0x27   :  { %645 = vmatprep.subr.bf16.mxu1 %v774_v0  ;;  %663 = vmatprep.subr.bf16.mxu0 %v774_v0  ;;  %v39_v2 = vld [vmem:[#allocation5] sm:$0xff]  ;;  %v40_v3 = vld [vmem:[#allocation5 + $0x8] sm:$0xff]  ;;  %v41_v4 = vld [vmem:[#allocation5 + $0x10] sm:$0xff]  ;;  %s777_s1 = smov [#allocation7]  }
  0x28   :  { %587 = vmatprep.mubr.msk.f32.mxu1 %vm775_vm0, %v776_v1  ;;  %620 = vmatprep.mubr.msk.f32.mxu0 %vm775_vm0, %v776_v1  ;;  %v48_v5 = vand.u32 4294901760, %v39_v2  ;;  %v51_v6 = vand.u32 4294901760, %v40_v3  ;;  %v42_v7 = vld [vmem:[#allocation5 + $0x18] sm:$0xff]  ;;  %v54_v8 = vand.u32 4294901760, %v41_v4  ;;  %s539_s6 = sshll.u32 %s777_s1, 4  ;;  %s540_s6 = int_to_ptr.vmem [resolvable:$true] %s539_s6 }
  0x29   :  { %v38_v9 = vld [vmem:[#allocation2] sm:$0xff]  ;;  %v57_v10 = vand.u32 4294901760, %v42_v7  ;;  %s742_s7 = scalar_lea.vmem %s540_s6, 128  ;;  %p747_p3 = scmp.lt.s32.totalorder %s540_s6, %s540_s6 }
  0x2a   :  { %v45_v11 = vsel %vm43_vm1, %v38_v9, 0  ;;  %v646_v12 = vpack.c.bf16 %v51_v6, %v48_v5  ;;  %v128_v13 = vsub.f32 %v39_v2, %v48_v5  ;;  %v135_v14 = vsub.f32 %v40_v3, %v51_v6  ;;  %p743_p2 = scmp.ne.s32.totalorder %s540_s6, %s742_s7  ;;  %p748_p4 = scmp.lt.s32.totalorder %s742_s7, %s742_s7 }
  0x2b   :  { %v142_v15 = vsub.f32 %v41_v4, %v54_v8  ;;  %v149_v16 = vsub.f32 %v42_v7, %v57_v10  ;;  %v116_v17 = vand.u32 4294901760, %v45_v11  ;;  %v649_v18 = vpack.c.bf16 %v57_v10, %v54_v8 }
  0x2c   :  { %647 = vmatpush3.bf16.msra.mxu1 %v646_v12  ;;  %665 = vmatpush3.bf16.msra.mxu0 %v646_v12  ;;  %v129_v19 = vand.u32 4294901760, %v128_v13  ;;  %v136_v20 = vand.u32 4294901760, %v135_v14  ;;  %v658_v39 = vpack.c.bf16 %v135_v14, %v128_v13  ;;  %p749_p5 = por %p748_p4, %p747_p3 }
  0x2d   :  { %v143_v21 = vand.u32 4294901760, %v142_v15  ;;  %648 = vmatprep.subr.bf16.mxu1 %v774_v0  ;;  %666 = vmatprep.subr.bf16.mxu0 %v774_v0  ;;  %v117_v22 = vsub.f32 %v45_v11, %v116_v17  ;;  %v150_v23 = vand.u32 4294901760, %v149_v16  ;;  %v661_v40 = vpack.c.bf16 %v149_v16, %v142_v15 }
  0x2e   :  { %v130_v24 = vsub.f32 %v128_v13, %v129_v19  ;;  %v137_v25 = vsub.f32 %v135_v14, %v136_v20  ;;  %v670_v31 = vpack.c.bf16 %v136_v20, %v129_v19  ;;  %p750_p6 = pnand %p749_p5, %p743_p2 }
  0x2f   :  { %v144_v26 = vsub.f32 %v142_v15, %v143_v21  ;;  %v118_v27 = vand.u32 4294901760, %v117_v22  ;;  %v151_v28 = vsub.f32 %v149_v16, %v150_v23  ;;  %v673_v37 = vpack.c.bf16 %v150_v23, %v143_v21 }
  0x30   :  { %650 = vmatpush3.bf16.msra.mxu1 %v649_v18  ;;  %668 = vmatpush3.bf16.msra.mxu0 %v649_v18  ;;  %v131_v29 = vand.u32 4294901760, %v130_v24  ;;  %v138_v30 = vand.u32 4294901760, %v137_v25 }
  0x31   :  { %v119_v32 = vsub.f32 %v117_v22, %v118_v27  ;;  %651 = vmatprep.subr.bf16.mxu1 %v774_v0  ;;  %669 = vmatprep.subr.bf16.mxu0 %v774_v0  ;;  %v145_v34 = vand.u32 4294901760, %v144_v26  ;;  %v152_v35 = vand.u32 4294901760, %v151_v28 }
  0x32   :  { %v652_v33 = vpack.c.bf16 %v138_v30, %v131_v29 }
  0x33   :  { %v120_v36 = vand.u32 4294901760, %v119_v32  ;;  %621 = vmatmul.mubr.f32.vlgmr.msra.gmra.mrb[0].mxu0 %v118_v27  ;;  %v655_v38 = vpack.c.bf16 %v152_v35, %v145_v34 }
  0x34   :  { %671 = vmatpush3.bf16.msra.mxu0 %v670_v31  ;;  %631 = vmatprep.mubr.msk.f32.mxu0 %vm775_vm0, %v776_v1 }
  0x35   :  { %588 = vmatmul.mubr.f32.vlgmr.msra.gmra.mrb[0].mxu1 %v120_v36  ;;  %672 = vmatprep.subr.bf16.mxu0 %v774_v0 }
  0x36   :  { %653 = vmatpush3.bf16.msra.mxu1 %v652_v33  ;;  %598 = vmatprep.mubr.msk.f32.mxu1 %vm775_vm0, %v776_v1 }
  0x37   :  { %654 = vmatprep.subr.bf16.mxu1 %v774_v0 }
  0x38   :  { %674 = vmatpush3.bf16.msra.mxu0 %v673_v37 }
  0x39   :  { %675 = vmatprep.subr.bf16.mxu0 %v774_v0 }
  0x3a   :  { %656 = vmatpush3.bf16.msra.mxu1 %v655_v38 }
  0x3b   :  { %657 = vmatprep.subr.bf16.mxu1 %v774_v0  ;;  %632 = vmatmul.mubr.f32.vlgmr.msra.gmra.mrb[0].mxu0 %v116_v17 }
  0x3c   :  { %677 = vmatpush3.bf16.msra.mxu0 %v646_v12  ;;  %642 = vmatprep.mubr.msk.f32.mxu0 %vm775_vm0, %v776_v1 }
  0x3d   :  { %599 = vmatmul.mubr.f32.vlgmr.msra.gmra.mrb[0].mxu1 %v116_v17  ;;  %678 = vmatprep.subr.bf16.mxu0 %v774_v0 }
  0x3e   :  { %659 = vmatpush3.bf16.msra.mxu1 %v658_v39  ;;  %609 = vmatprep.mubr.msk.f32.mxu1 %vm775_vm0, %v776_v1 }
  0x3f   :  { %660 = vmatprep.subr.bf16.mxu1 %v774_v0 }
  0x40   :  { %680 = vmatpush3.bf16.msra.mxu0 %v649_v18 }
  0x42   :  { %662 = vmatpush3.bf16.msra.mxu1 %v661_v40 }
  0x43   :  { %643 = vmatmul.mubr.f32.vlgmr.msra.gmra.mrb[0].mxu0 %v116_v17 }
  0x45   :  { %610 = vmatmul.mubr.f32.vlgmr.msra.gmra.mrb[0].mxu1 %v117_v22 }
 0x116   :  { %v528_v41 = vpop.f32.mrb[0].mxu0 }
 0x117   :  { %v644_v42 = vpop.f32.mrb[1].mxu0 }
 0x118   :  { %v293_v43 = vpop.f32.mrb[0].mxu1 }
 0x119   :  { %v681_v44 = vadd.f32 %v528_v41, %v293_v43  ;;  %v611_v45 = vpop.f32.mrb[1].mxu1 }
 0x11b   :  { %532 = vst.msk [vmem:[#allocation7] sm:$0xff] %vm43_vm1, %v681_v44 }
 0x11c   :  { %753 = shalt.err (!%p750_p6)
}
 0x11d   :  { %s754_s10 = scalar_lea.hbm %s864_s2, 128 }
 0x11e   :  { %p755_p7 = scmp.ne.s32.totalorder %s864_s2, %s754_s10  ;;  %p758_p8 = scmp.lt.u32.totalorder %s754_s10, %s864_s2 }
 0x120   :  { %p760_p9 = pnand %p758_p8, %p755_p7 }
 0x122   :  { %763 = shalt.err (!%p760_p9)
}
 0x123   :  { %542 = dma.vmem_to_hbm [thread:$0]  %s540_s6, 128, %s864_s2, [#allocation4]  }
 0x124   :  { %768 = dma.done.wait [#allocation4], 128  }
 0x125   :  { %769 = vsyncadd [#allocation4], 4294967168 }
 0x126   :  { %546 = vsyncpa [#allocation3], 1 }
 0x127   :  { %547 = vsyncpa [#allocation6], 1 }
 0x128   :  { %548 = vsyncpa [#allocation4], 1 }

// kernel: tpu_custom_call.1
= control target key start
LH: loop header
LB: loop body
LE: loop exit
PB: predicated region body
PF: predicated region fallthrough
CT: control target
= control target key end

     0   :  { %7 = vsyncpa [#allocation3], 0  ;;  %s862_s0 = inlined_call_operand.hbm [shape: f32[8,32], index: 0, kind: input, shape index: {}]   ;;  %s863_s1 = inlined_call_operand.hbm [shape: f32[32,32], index: 1, kind: input, shape index: {}]   ;;  %s864_s2 = inlined_call_operand.hbm [shape: f32[8,32], index: 2, kind: output, shape index: {}]  }
   0x1   :  { %8 = vsyncpa [#allocation6], 0 }
   0x2   :  { %9 = vsyncpa [#allocation4], 0  ;;  %s770_s9 = smov [#allocation2]   ;;  %s771_s11 = smov [#allocation5]  }
   0x3   :  { %s16_s10 = sshll.u32 %s770_s9, 4  ;;  %s25_s12 = sshll.u32 %s771_s11, 4  ;;  %s17_s10 = int_to_ptr.vmem [resolvable:$true] %s16_s10  ;;  %s793_s12 = int_to_ptr.vmem [resolvable:$true] %s25_s12 }
   0x4   :  { %s698_s15 = scalar_lea.hbm %s862_s0, 128 }
   0x5   :  { %p699_p0 = scmp.ne.s32.totalorder %s862_s0, %s698_s15  ;;  %p702_p1 = scmp.lt.u32.totalorder %s698_s15, %s862_s0 }
   0x7   :  { %p704_p2 = pnand %p702_p1, %p699_p0 }
   0x9   :  { %707 = shalt.err (!%p704_p2)
}
   0xa   :  { %s708_s20 = scalar_lea.vmem %s17_s10, 128  ;;  %p713_p4 = scmp.lt.s32.totalorder %s17_s10, %s17_s10 }
   0xb   :  { %p709_p3 = scmp.ne.s32.totalorder %s17_s10, %s708_s20  ;;  %p714_p5 = scmp.lt.s32.totalorder %s708_s20, %s708_s20 }
   0xd   :  { %p715_p6 = por %p714_p5, %p713_p4 }
   0xf   :  { %p716_p7 = pnand %p715_p6, %p709_p3 }
  0x11   :  { %719 = shalt.err (!%p716_p7)
}
  0x12   :  { %19 = dma.hbm_to_vmem [thread:$0]  %s862_s0, 128, %s17_s10, [#allocation3]  }
  0x13   :  { %s720_s25 = scalar_lea.hbm %s863_s1, 512 }
  0x14   :  { %p721_p8 = scmp.ne.s32.totalorder %s863_s1, %s720_s25  ;;  %p724_p9 = scmp.lt.u32.totalorder %s720_s25, %s863_s1 }
  0x16   :  { %p726_p10 = pnand %p724_p9, %p721_p8 }
  0x18   :  { %729 = shalt.err (!%p726_p10)
}
  0x19   :  { %s730_s30 = scalar_lea.vmem %s793_s12, 512  ;;  %p735_p12 = scmp.lt.s32.totalorder %s793_s12, %s793_s12 }
  0x1a   :  { %p731_p11 = scmp.ne.s32.totalorder %s793_s12, %s730_s30  ;;  %p736_p13 = scmp.lt.s32.totalorder %s730_s30, %s730_s30 }
  0x1c   :  { %p737_p0 = por %p736_p13, %p735_p12 }
  0x1e   :  { %p738_p1 = pnand %p737_p0, %p731_p11 }
  0x20   :  { %741 = shalt.err (!%p738_p1)
}
  0x21   :  { %s772_s0 = smov 128   ;;  %s773_s3 = smov 8  }
  0x22   :  { %31 = dma.hbm_to_vmem [thread:$0]  %s863_s1, 512, %s793_s12, [#allocation6], %s772_s0, %s772_s0, %s773_s3  }
  0x23   :  { %764 = dma.done.wait [#allocation3], 128  }
  0x24   :  { %765 = vsyncadd [#allocation3], 4294967168 }
  0x25   :  { %766 = dma.done.wait [#allocation6], 512  }
  0x26   :  { %767 = vsyncadd [#allocation6], 4294966784  ;;  %v774_v0 = vmov 0.0|0.0   ;;  %vm775_vm0 = vmmov 0   ;;  %v776_v1 = vmov 0.0   ;;  %vm43_vm1 = vcmask 261120  }
  0x27   :  { %645 = vmatprep.subr.bf16.mxu1 %v774_v0  ;;  %663 = vmatprep.subr.bf16.mxu0 %v774_v0  ;;  %v39_v2 = vld [vmem:[#allocation5] sm:$0xff]  ;;  %v40_v3 = vld [vmem:[#allocation5 + $0x8] sm:$0xff]  ;;  %v41_v4 = vld [vmem:[#allocation5 + $0x10] sm:$0xff]  ;;  %s777_s1 = smov [#allocation7]  }
  0x28   :  { %587 = vmatprep.mubr.msk.f32.mxu1 %vm775_vm0, %v776_v1  ;;  %620 = vmatprep.mubr.msk.f32.mxu0 %vm775_vm0, %v776_v1  ;;  %v48_v5 = vand.u32 4294901760, %v39_v2  ;;  %v51_v6 = vand.u32 4294901760, %v40_v3  ;;  %v42_v7 = vld [vmem:[#allocation5 + $0x18] sm:$0xff]  ;;  %v54_v8 = vand.u32 4294901760, %v41_v4  ;;  %s539_s6 = sshll.u32 %s777_s1, 4  ;;  %s540_s6 = int_to_ptr.vmem [resolvable:$true] %s539_s6 }
  0x29   :  { %v38_v9 = vld [vmem:[#allocation2] sm:$0xff]  ;;  %v57_v10 = vand.u32 4294901760, %v42_v7  ;;  %s742_s7 = scalar_lea.vmem %s540_s6, 128  ;;  %p747_p3 = scmp.lt.s32.totalorder %s540_s6, %s540_s6 }
  0x2a   :  { %v45_v11 = vsel %vm43_vm1, %v38_v9, 0  ;;  %v646_v12 = vpack.c.bf16 %v51_v6, %v48_v5  ;;  %v128_v13 = vsub.f32 %v39_v2, %v48_v5  ;;  %v135_v14 = vsub.f32 %v40_v3, %v51_v6  ;;  %p743_p2 = scmp.ne.s32.totalorder %s540_s6, %s742_s7  ;;  %p748_p4 = scmp.lt.s32.totalorder %s742_s7, %s742_s7 }
  0x2b   :  { %v142_v15 = vsub.f32 %v41_v4, %v54_v8  ;;  %v149_v16 = vsub.f32 %v42_v7, %v57_v10  ;;  %v116_v17 = vand.u32 4294901760, %v45_v11  ;;  %v649_v18 = vpack.c.bf16 %v57_v10, %v54_v8 }
  0x2c   :  { %647 = vmatpush3.bf16.msra.mxu1 %v646_v12  ;;  %665 = vmatpush3.bf16.msra.mxu0 %v646_v12  ;;  %v129_v19 = vand.u32 4294901760, %v128_v13  ;;  %v136_v20 = vand.u32 4294901760, %v135_v14  ;;  %v658_v39 = vpack.c.bf16 %v135_v14, %v128_v13  ;;  %p749_p5 = por %p748_p4, %p747_p3 }
  0x2d   :  { %v143_v21 = vand.u32 4294901760, %v142_v15  ;;  %648 = vmatprep.subr.bf16.mxu1 %v774_v0  ;;  %666 = vmatprep.subr.bf16.mxu0 %v774_v0  ;;  %v117_v22 = vsub.f32 %v45_v11, %v116_v17  ;;  %v150_v23 = vand.u32 4294901760, %v149_v16  ;;  %v661_v40 = vpack.c.bf16 %v149_v16, %v142_v15 }
  0x2e   :  { %v130_v24 = vsub.f32 %v128_v13, %v129_v19  ;;  %v137_v25 = vsub.f32 %v135_v14, %v136_v20  ;;  %v670_v31 = vpack.c.bf16 %v136_v20, %v129_v19  ;;  %p750_p6 = pnand %p749_p5, %p743_p2 }
  0x2f   :  { %v144_v26 = vsub.f32 %v142_v15, %v143_v21  ;;  %v118_v27 = vand.u32 4294901760, %v117_v22  ;;  %v151_v28 = vsub.f32 %v149_v16, %v150_v23  ;;  %v673_v37 = vpack.c.bf16 %v150_v23, %v143_v21 }
  0x30   :  { %650 = vmatpush3.bf16.msra.mxu1 %v649_v18  ;;  %668 = vmatpush3.bf16.msra.mxu0 %v649_v18  ;;  %v131_v29 = vand.u32 4294901760, %v130_v24  ;;  %v138_v30 = vand.u32 4294901760, %v137_v25 }
  0x31   :  { %v119_v32 = vsub.f32 %v117_v22, %v118_v27  ;;  %651 = vmatprep.subr.bf16.mxu1 %v774_v0  ;;  %669 = vmatprep.subr.bf16.mxu0 %v774_v0  ;;  %v145_v34 = vand.u32 4294901760, %v144_v26  ;;  %v152_v35 = vand.u32 4294901760, %v151_v28 }
  0x32   :  { %v652_v33 = vpack.c.bf16 %v138_v30, %v131_v29 }
  0x33   :  { %v120_v36 = vand.u32 4294901760, %v119_v32  ;;  %621 = vmatmul.mubr.f32.vlgmr.msra.gmra.mrb[0].mxu0 %v118_v27  ;;  %v655_v38 = vpack.c.bf16 %v152_v35, %v145_v34 }
  0x34   :  { %671 = vmatpush3.bf16.msra.mxu0 %v670_v31  ;;  %631 = vmatprep.mubr.msk.f32.mxu0 %vm775_vm0, %v776_v1 }
  0x35   :  { %588 = vmatmul.mubr.f32.vlgmr.msra.gmra.mrb[0].mxu1 %v120_v36  ;;  %672 = vmatprep.subr.bf16.mxu0 %v774_v0 }
  0x36   :  { %653 = vmatpush3.bf16.msra.mxu1 %v652_v33  ;;  %598 = vmatprep.mubr.msk.f32.mxu1 %vm775_vm0, %v776_v1 }
  0x37   :  { %654 = vmatprep.subr.bf16.mxu1 %v774_v0 }
  0x38   :  { %674 = vmatpush3.bf16.msra.mxu0 %v673_v37 }
  0x39   :  { %675 = vmatprep.subr.bf16.mxu0 %v774_v0 }
  0x3a   :  { %656 = vmatpush3.bf16.msra.mxu1 %v655_v38 }
  0x3b   :  { %657 = vmatprep.subr.bf16.mxu1 %v774_v0  ;;  %632 = vmatmul.mubr.f32.vlgmr.msra.gmra.mrb[0].mxu0 %v116_v17 }
  0x3c   :  { %677 = vmatpush3.bf16.msra.mxu0 %v646_v12  ;;  %642 = vmatprep.mubr.msk.f32.mxu0 %vm775_vm0, %v776_v1 }
  0x3d   :  { %599 = vmatmul.mubr.f32.vlgmr.msra.gmra.mrb[0].mxu1 %v116_v17  ;;  %678 = vmatprep.subr.bf16.mxu0 %v774_v0 }
  0x3e   :  { %659 = vmatpush3.bf16.msra.mxu1 %v658_v39  ;;  %609 = vmatprep.mubr.msk.f32.mxu1 %vm775_vm0, %v776_v1 }
  0x3f   :  { %660 = vmatprep.subr.bf16.mxu1 %v774_v0 }
  0x40   :  { %680 = vmatpush3.bf16.msra.mxu0 %v649_v18 }
  0x42   :  { %662 = vmatpush3.bf16.msra.mxu1 %v661_v40 }
  0x43   :  { %643 = vmatmul.mubr.f32.vlgmr.msra.gmra.mrb[0].mxu0 %v116_v17 }
  0x45   :  { %610 = vmatmul.mubr.f32.vlgmr.msra.gmra.mrb[0].mxu1 %v117_v22 }
 0x116   :  { %v528_v41 = vpop.f32.mrb[0].mxu0 }
 0x117   :  { %v644_v42 = vpop.f32.mrb[1].mxu0 }
 0x118   :  { %v293_v43 = vpop.f32.mrb[0].mxu1 }
 0x119   :  { %v681_v44 = vadd.f32 %v528_v41, %v293_v43  ;;  %v611_v45 = vpop.f32.mrb[1].mxu1 }
 0x11b   :  { %532 = vst.msk [vmem:[#allocation7] sm:$0xff] %vm43_vm1, %v681_v44 }
 0x11c   :  { %753 = shalt.err (!%p750_p6)
}
 0x11d   :  { %s754_s10 = scalar_lea.hbm %s864_s2, 128 }
 0x11e   :  { %p755_p7 = scmp.ne.s32.totalorder %s864_s2, %s754_s10  ;;  %p758_p8 = scmp.lt.u32.totalorder %s754_s10, %s864_s2 }
 0x120   :  { %p760_p9 = pnand %p758_p8, %p755_p7 }
 0x122   :  { %763 = shalt.err (!%p760_p9)
}
 0x123   :  { %542 = dma.vmem_to_hbm [thread:$0]  %s540_s6, 128, %s864_s2, [#allocation4]  }
 0x124   :  { %768 = dma.done.wait [#allocation4], 128  }
 0x125   :  { %769 = vsyncadd [#allocation4], 4294967168 }
 0x126   :  { %546 = vsyncpa [#allocation3], 1 }
 0x127   :  { %547 = vsyncpa [#allocation6], 1 }
 0x128   :  { %548 = vsyncpa [#allocation4], 1 }

</bundles_post_ra>
